<compile_context>
chip_gen: v7x
topology: tpu7x:2x2x1
jax: 0.10.0
libtpu: 0.0.40
codegen_flags: <defaults>
</compile_context>

<pallas_src>
import functools
import math

import jax
import jax.numpy as jnp
from jax.experimental import pallas as pl
from jax.experimental.pallas import tpu as pltpu


def _self_attn_kernel(x_ref, sel_ref, out_ref, *, head_dim):
    x = x_ref[...]                                     # (B, T, D) float32, lane-dense in D
    B, T, D = x.shape
    scale = 1.0 / math.sqrt(head_dim)

    # key.transpose(-1,-2).sum(3).unsqueeze(2)  ==  sum over the sequence dim (per channel).
    k_sum = jnp.sum(x, axis=1, keepdims=True)          # (B, 1, D)

    # softmax numerator; tanh in [-1, 1] => exp cannot overflow, so skip max-subtraction.
    e = jnp.exp(jnp.tanh(x * k_sum * scale))           # (B, T, D)
    ev = e * x                                         # numerator * value

    # Segmented (per-head) sums over the channel dim as tiny MXU matmuls with a one-hot
    # head-selection matrix; keeps everything lane-dense, no cross-lane XLU reductions.
    sel = sel_ref[...]                                 # (D, H), sel[d, h] = 1 iff d in head h
    den = jnp.dot(e.reshape(B * T, D), sel, preferred_element_type=jnp.float32)   # (B*T, H)
    num = jnp.dot(ev.reshape(B * T, D), sel, preferred_element_type=jnp.float32)  # (B*T, H)

    # out[b*T + t, h] == v_value[h, b, t] of the torch code (its trailing size-1 softmax == 1).
    out_ref[...] = (num * pl.reciprocal(den, approx=True)).astype(out_ref.dtype)


def self_attention_layer2(x, *, num_heads=8):
    """SelfAttentionLayer2 forward. x: (B, T, model_dim) -> (B, num_heads, T)."""
    B, T, D = x.shape
    H = num_heads
    Hd = D // H
    assert H * Hd == D
    # NOTE: the PyTorch __init__ hard-codes nn.Linear(10, 1), so head_dim must be 10 for
    # the original module to run; the Linear weights never affect the output (dead branch).

    # One-hot head-selection matrix: sel[d, h] = 1 iff channel d belongs to head h.
    sel = (jnp.arange(D)[:, None] // Hd == jnp.arange(H)[None, :]).astype(x.dtype)

    kernel = functools.partial(_self_attn_kernel, head_dim=Hd)

    itemsize = jnp.dtype(x.dtype).itemsize
    cost = pl.CostEstimate(
        flops=int(2 * 2 * (B * T) * D * H + 6 * B * T * D),          # 2 small matmuls + elementwise
        transcendentals=int(2 * B * T * D + B * T * H),              # tanh + exp + recip
        bytes_accessed=int((B * T * D + D * H + B * T * H) * itemsize),
    )

    # Whole problem (< 10 KiB per input at these shapes) lives in VMEM with no grid.
    # If B or T grows beyond toy sizes, add grid=(B // bb,) with real BlockSpecs and
    # dimension_semantics=("parallel",) so v7x (64 MiB VMEM, 2 TensorCores) tiles/shards it.
    out_bt_h = pl.pallas_call(
        kernel,
        out_shape=jax.ShapeDtypeStruct((B * T, H), x.dtype),
        in_specs=[
            pl.BlockSpec(memory_space=pltpu.MemorySpace.VMEM),  # x   (B, T, D)
            pl.BlockSpec(memory_space=pltpu.MemorySpace.VMEM),  # sel (D, H)
        ],
        out_specs=pl.BlockSpec(memory_space=pltpu.MemorySpace.VMEM),
        cost_estimate=cost,
    )(x, sel)

    # (B*T, H) -> (B, T, H) -> (B, H, T): 512-byte layout fixup, left to XLA.
    return jnp.transpose(out_bt_h.reshape(B, T, H), (0, 2, 1))


def reference(x, w, b, *, num_heads=8):
    """Pure-JAX mirror of the full PyTorch forward (including the dead Linear branch)."""
    B, T, D = x.shape
    H = num_heads
    Hd = D // H
    sh = lambda a: a.reshape(B, T, H, Hd).transpose(2, 0, 1, 3)      # (H, B, T, Hd)
    q = k = v = sh(x)
    k_sum = k.sum(axis=2, keepdims=True)                             # (H, B, 1, Hd)
    attn = jax.nn.softmax(jnp.tanh(q * k_sum / math.sqrt(Hd)), axis=-1)
    t_out = attn * v
    v_q = t_out.sum(axis=2)                                          # (H, B, Hd)
    v_k = t_out.sum(axis=2)
    v_v = t_out.sum(axis=3).transpose(1, 0, 2)                       # (B, H, T)
    proj = (v_q * v_k) @ w.T + b                                     # (H, B, 1)
    va = jax.nn.softmax(jnp.tanh(proj), axis=-1).transpose(1, 0, 2)  # (B, H, 1) == 1.0
    return v_v * va


if __name__ == "__main__":
    root = jax.random.PRNGKey(0)
    kx, kw, kb = jax.random.split(root, 3)

    B, T = 2, 8
    num_heads = 8
    head_dim = 10                      # forced by the hard-coded nn.Linear(10, 1)
    model_dim = num_heads * head_dim   # 80

    x = jax.random.normal(kx, (B, T, model_dim), jnp.float32)

    # nn.Linear(10, 1) parameters (only used by the reference's dead branch).
    bound = 1.0 / math.sqrt(head_dim)
    w = jax.random.uniform(kw, (1, head_dim), jnp.float32, -bound, bound)
    b = jax.random.uniform(kb, (1,), jnp.float32, -bound, bound)

    out = self_attention_layer2(x, num_heads=num_heads)
    out = jax.block_until_ready(out)

    ref = reference(x, w, b, num_heads=num_heads)
    assert out.shape == (B, num_heads, T), out.shape
    # approx reciprocal (EUP vrcp) in the softmax normalization -> slightly looser tolerance
    assert bool(jnp.allclose(out, ref, atol=5e-3, rtol=5e-3)), "mismatch vs reference"

    print("KERNEL_OK")
</pallas_src>

<mosaic_0001>
module attributes {stable_mosaic.version = 11 : i64} {
  func.func @_self_attn_kernel(%arg0: memref<2x8x80xf32, #tpu.memory_space<vmem>>, %arg1: memref<80x8xf32, #tpu.memory_space<vmem>>, %arg2: memref<16x8xf32, #tpu.memory_space<vmem>>) attributes {dimension_semantics = [], scalar_prefetch = 0 : i64, scratch_operands = 0 : i64, tpu.core_type = #tpu.core_type<tc>} {
    %c0 = arith.constant 0 : index
    %c0_0 = arith.constant 0 : index
    %c0_1 = arith.constant 0 : index
    %0 = vector.load %arg0[%c0, %c0_0, %c0_1] : memref<2x8x80xf32, #tpu.memory_space<vmem>>, vector<2x8x80xf32>
    %cst = arith.constant dense<0.000000e+00> : vector<2x80xf32>
    %1 = vector.multi_reduction <add>, %0, %cst [1] : vector<2x8x80xf32> to vector<2x80xf32>
    %2 = vector.shape_cast %1 : vector<2x80xf32> to vector<2x1x80xf32>
    %3 = vector.broadcast %2 : vector<2x1x80xf32> to vector<2x8x80xf32>
    %4 = arith.mulf %0, %3 : vector<2x8x80xf32>
    %cst_2 = arith.constant 0.316227764 : f32
    %5 = vector.broadcast %cst_2 : f32 to vector<2x8x80xf32>
    %6 = arith.mulf %4, %5 : vector<2x8x80xf32>
    %7 = math.tanh %6 : vector<2x8x80xf32>
    %8 = math.exp %7 : vector<2x8x80xf32>
    %9 = arith.mulf %8, %0 : vector<2x8x80xf32>
    %c0_3 = arith.constant 0 : index
    %c0_4 = arith.constant 0 : index
    %10 = vector.load %arg1[%c0_3, %c0_4] : memref<80x8xf32, #tpu.memory_space<vmem>>, vector<80x8xf32>
    %11 = vector.shape_cast %8 : vector<2x8x80xf32> to vector<16x80xf32>
    %cst_5 = arith.constant dense<0.000000e+00> : vector<16x8xf32>
    %12 = tpu.matmul %11, %10, %cst_5 {dimension_numbers = #tpu.dot_dimension_numbers<[1], [0], [0], [1], [0, 0, 1, 1], [], []>} : vector<16x80xf32>, vector<80x8xf32>, vector<16x8xf32> -> vector<16x8xf32>
    %13 = vector.shape_cast %9 : vector<2x8x80xf32> to vector<16x80xf32>
    %cst_6 = arith.constant dense<0.000000e+00> : vector<16x8xf32>
    %14 = tpu.matmul %13, %10, %cst_6 {dimension_numbers = #tpu.dot_dimension_numbers<[1], [0], [0], [1], [0, 0, 1, 1], [], []>} : vector<16x80xf32>, vector<80x8xf32>, vector<16x8xf32> -> vector<16x8xf32>
    %15 = tpu.reciprocal %12 {approx = true} : vector<16x8xf32> -> vector<16x8xf32>
    %16 = arith.mulf %14, %15 : vector<16x8xf32>
    %c0_7 = arith.constant 0 : index
    %c0_8 = arith.constant 0 : index
    %17 = vector.load %arg2[%c0_7, %c0_8] : memref<16x8xf32, #tpu.memory_space<vmem>>, vector<16x8xf32>
    tpu.vector_store %arg2[%c0_7, %c0_8], %16 {strides = array<i32>} : memref<16x8xf32, #tpu.memory_space<vmem>>, vector<16x8xf32>,
    return
  }
}

</mosaic_0001>

<bundles_post_ra>
// kernel: tpu_custom_call.1
= control target key start
LH: loop header
LB: loop body
LE: loop exit
PB: predicated region body
PF: predicated region fallthrough
CT: control target
= control target key end

     0   :  { %vm13_vm0 = vcmask 654336   ;;  %vm216_vm1 = vcmask 64512   ;;  %s412_s1 = inlined_call_operand.vmem [shape: f32[80,8], index: 1, kind: input, shape index: {}]   ;;  %s413_s0 = inlined_call_operand.vmem [shape: f32[2,8,80], index: 0, kind: input, shape index: {}]   ;;  %s414_s2 = inlined_call_operand.vmem [shape: f32[16,8], index: 2, kind: output, shape index: {}]  }
   0x1   :  { %v40_v0 = vld [vmem:[%s412_s1] sm:$0xff]  ;;  %v41_v1 = vld [vmem:[%s412_s1 + $0x8] sm:$0xff]  ;;  %v42_v2 = vld [vmem:[%s412_s1 + $0x10] sm:$0xff] }
   0x2   :  { %v297_v3 = vpack.c.bf16 %v41_v1, %v40_v0  ;;  %v43_v4 = vld [vmem:[%s412_s1 + $0x18] sm:$0xff]  ;;  %v44_v6 = vld [vmem:[%s412_s1 + $0x20] sm:$0xff]  ;;  %v45_v7 = vld [vmem:[%s412_s1 + $0x28] sm:$0xff] }
   0x3   :  { %v301_v5 = vpack.c.bf16 %v43_v4, %v42_v2  ;;  %v11_v8 = vld [vmem:[%s413_s0] sm:$0xff]  ;;  %v12_v9 = vld [vmem:[%s413_s0 + $0x8] sm:$0xff]  ;;  %v305_v12 = vpack.c.bf16 %v45_v7, %v44_v6  ;;  %v46_v15 = vld [vmem:[%s412_s1 + $0x30] sm:$0xff] }
   0x4   :  { %298 = vmatprep.subr.bf16.mxu0 %v297_v3  ;;  %318 = vmatprep.subr.bf16.mxu1 %v297_v3  ;;  %v14_v10 = vsel %vm13_vm0, %v11_v8, 0.0  ;;  %v21_v11 = vsel %vm13_vm0, %v12_v9, 0.0  ;;  %v47_v16 = vld [vmem:[%s412_s1 + $0x38] sm:$0xff]  ;;  %v48_v22 = vld [vmem:[%s412_s1 + $0x40] sm:$0xff]  ;;  %v49_v23 = vld [vmem:[%s412_s1 + $0x48] sm:$0xff] }
   0x5   :  { %300 = vmatpush3.bf16.msra.mxu0 %v297_v3  ;;  %320 = vmatpush3.bf16.msra.mxu1 %v297_v3  ;;  %v15_v13 = vrot.slane %v14_v10, 4  ;;  %v22_v14 = vrot.slane %v21_v11, 4  ;;  %v309_v19 = vpack.c.bf16 %v47_v16, %v46_v15  ;;  %v313_v26 = vpack.c.bf16 %v49_v23, %v48_v22 }
   0x6   :  { %302 = vmatprep.subr.bf16.mxu0 %v301_v5  ;;  %322 = vmatprep.subr.bf16.mxu1 %v301_v5 }
   0x7   :  { %v16_v17 = vadd.f32 %v15_v13, %v14_v10  ;;  %v23_v18 = vadd.f32 %v22_v14, %v21_v11 }
   0x9   :  { %304 = vmatpush3.bf16.msra.mxu0 %v301_v5  ;;  %324 = vmatpush3.bf16.msra.mxu1 %v301_v5  ;;  %v17_v20 = vrot.slane %v16_v17, 2  ;;  %v24_v21 = vrot.slane %v23_v18, 2 }
   0xa   :  { %306 = vmatprep.subr.bf16.mxu0 %v305_v12  ;;  %326 = vmatprep.subr.bf16.mxu1 %v305_v12 }
   0xb   :  { %v18_v24 = vadd.f32 %v17_v20, %v16_v17  ;;  %v25_v25 = vadd.f32 %v24_v21, %v23_v18 }
   0xd   :  { %308 = vmatpush3.bf16.msra.mxu0 %v305_v12  ;;  %328 = vmatpush3.bf16.msra.mxu1 %v305_v12  ;;  %v19_v27 = vrot.slane %v18_v24, 1  ;;  %v26_v28 = vrot.slane %v25_v25, 1 }
   0xe   :  { %310 = vmatprep.subr.bf16.mxu0 %v309_v19  ;;  %330 = vmatprep.subr.bf16.mxu1 %v309_v19 }
   0xf   :  { %v20_v29 = vadd.f32 %v19_v27, %v18_v24  ;;  %v27_v30 = vadd.f32 %v26_v28, %v25_v25 }
  0x11   :  { %312 = vmatpush3.bf16.msra.mxu0 %v309_v19  ;;  %332 = vmatpush3.bf16.msra.mxu1 %v309_v19  ;;  %v28_v31 = vmul.f32 %v20_v29, %v11_v8  ;;  %v29_v32 = vmul.f32 %v27_v30, %v12_v9 }
  0x12   :  { %314 = vmatprep.subr.bf16.mxu0 %v313_v26  ;;  %334 = vmatprep.subr.bf16.mxu1 %v313_v26 }
  0x13   :  { %v30_v33 = vmul.f32 0.31622776, %v28_v31  ;;  %v31_v34 = vmul.f32 0.31622776, %v29_v32 }
  0x15   :  { %316 = vmatpush3.bf16.msra.mxu0 %v313_v26  ;;  %336 = vmatpush3.bf16.msra.mxu1 %v313_v26  ;;  %337 = vtanh.f32 %v30_v33 }
  0x16   :  { %339 = vtanh.f32 %v31_v34 }
  0x1f   :  { %v338_v35 = vpop.eup %337 }
  0x20   :  { %v340_v36 = vpop.eup %339  ;;  %v34_v37 = vmul.f32 1.442695, %v338_v35 }
  0x21   :  { %v36_v38 = vmul.f32 1.442695, %v340_v36 }
  0x22   :  { %341 = vpow2.f32 %v34_v37 }
  0x23   :  { %343 = vpow2.f32 %v36_v38 }
  0x2c   :  { %v342_v39 = vpop.eup %341 }
  0x2d   :  { %v344_v40 = vpop.eup %343  ;;  %271 = vmatprep.mubr.msk.f32.mxu0 %vm13_vm0, %v342_v39  ;;  %v38_v41 = vmul.f32 %v342_v39, %v11_v8 }
  0x2e   :  { %272 = vmatmul.mubr.msk.f32.vlgmr.msra.gmra.mrb[0].mxu0 %vm13_vm0, %v344_v40  ;;  %v39_v42 = vmul.f32 %v344_v40, %v12_v9 }
  0x2f   :  { %294 = vmatprep.mubr.msk.f32.mxu1 %vm13_vm0, %v38_v41 }
  0x30   :  { %295 = vmatmul.mubr.msk.f32.vlgmr.msra.gmra.mrb[0].mxu1 %vm13_vm0, %v39_v42 }
 0x101   :  { %v273_v43 = vpop.f32.mrb[0].mxu0 }
 0x102   :  { %345 = vrcp.f32 %v273_v43  ;;  %v122_v44 = vpop.f32.mrb[1].mxu0 }
 0x103   :  { %347 = vrcp.f32 %v122_v44  ;;  %v296_v45 = vpop.f32.mrb[0].mxu1 }
 0x104   :  { %v203_v46 = vpop.f32.mrb[1].mxu1 }
 0x10c   :  { %v346_v47 = vpop.eup %345 }
 0x10d   :  { %v348_v48 = vpop.eup %347  ;;  %v215_v49 = vmul.f32 %v346_v47, %v296_v45 }
 0x10e   :  { %v214_v50 = vmul.f32 %v348_v48, %v203_v46 }
 0x10f   :  { %218 = vst.msk [vmem:[%s414_s2 + $0x8] sm:$0xff] %vm216_vm1, %v215_v49 }
 0x110   :  { %217 = vst.msk [vmem:[%s414_s2] sm:$0xff] %vm216_vm1, %v214_v50 }

</bundles_post_ra>
